<compile_context>
chip_gen: v7x
topology: tpu7x:2x2x1
jax: 0.10.0
libtpu: 0.0.40
codegen_flags: <defaults>
</compile_context>

<pallas_src>
import jax
import jax.numpy as jnp
from jax.experimental import pallas as pl
from jax.experimental.pallas import tpu as pltpu


def _pe_kernel(ids_ref, emb_ref, pe_ref, out_ref):
    # ids_ref: (BB, TS) int32   lane-dense token-id row block
    # emb_ref: (V, D)   f32     full embedding table, resident in VMEM (1 copy)
    # pe_ref:  (TS, D)  f32     positional-encoding tile for this sequence tile
    # out_ref: (BB, TS, D) f32  output tile
    BB, TS = ids_ref.shape
    V, D = emb_ref.shape

    ids = ids_ref[...]                                           # (BB, TS)
    emb = emb_ref[...]                                           # (V, D)
    pe = pe_ref[...]                                             # (TS, D)

    # Vocab index along the sublane axis; ids broadcast along sublanes (free).
    vocab_iota = jax.lax.broadcasted_iota(jnp.int32, (V, TS), 0)

    for b in range(BB):                                          # BB small, static unroll
        row_ids = ids[b:b + 1, :]                                # (1, TS)
        one_hot = (vocab_iota == row_ids).astype(jnp.float32)    # (V, TS)
        # Batched row gather as one MXU matmul: (V, TS)^T . (V, D) -> (TS, D).
        # TODO(synk): a bf16 one-hot (0/1 exact) against a bf16 table would cut
        # MXU passes and halve table VMEM; kept f32 x f32 HIGHEST here so the
        # gather stays bit-exact vs. the f32 nn.Embedding reference.
        gathered = jax.lax.dot_general(
            one_hot, emb,
            dimension_numbers=(((0,), (0,)), ((), ())),
            preferred_element_type=jnp.float32,
            precision=jax.lax.Precision.HIGHEST,
        )                                                        # (TS, D)
        out_ref[b] = (gathered + pe).astype(out_ref.dtype)


def _pick_seq_tile(S, cap=1024):
    """Largest divisor of S that is <= cap, preferring 128-/8-aligned tiles."""
    if S <= cap:
        return S
    divs = [d for d in range(1, cap + 1) if S % d == 0]
    for align in (128, 8, 1):
        cands = [d for d in divs if d % align == 0]
        if cands:
            return max(cands)
    return S


def _pick_batch_tile(B, TS, D, target_bytes=512 * 1024, out_budget=8 << 20):
    """Fold batch rows per step until the output slab is ~512 KB (VMEM permitting)."""
    row_bytes = TS * D * 4
    want = -(-target_bytes // row_bytes)                 # ceil: rows to hit target
    fit = max(1, out_budget // (2 * row_bytes))          # double-buffered out tile
    cap = max(1, min(want, fit, 32))                     # bound static unroll
    if B <= cap:
        return B                                         # full batch dim -> always legal
    cands = [d for d in range(1, cap + 1)
             if B % d == 0 and (d % 8 == 0 or d == 1)]   # keep ids block sublane-legal
    return max(cands) if cands else 1


def positional_encoding_forward(x_ids, emb_table, pos_enc, *,
                                seq_tile=None, batch_tile=None):
    """x_ids: (B, S) int; emb_table: (V, D); pos_enc: (S, D) -> (B, S, D)."""
    B, S = x_ids.shape
    V, D = emb_table.shape
    assert pos_enc.shape == (S, D), "S must equal max_seq_len (PyTorch broadcast rule)"

    # Small-vocab, resident-table path only.
    table_bytes = V * D * 4
    assert table_bytes <= (48 << 20), (
        "embedding table too large for the resident-VMEM one-hot gather path")
    # TODO(synk): large-vocab path — scalar-prefetched ids (num_scalar_prefetch=1)
    # driving a manual make_async_copy row-gather pipeline instead of the
    # resident table + one-hot matmul.

    TS = seq_tile if seq_tile is not None else _pick_seq_tile(S)
    assert S % TS == 0, "sequence tile must divide S"
    BB = batch_tile if batch_tile is not None else _pick_batch_tile(B, TS, D)
    assert B % BB == 0, "batch tile must divide B"
    num_st = S // TS
    num_bt = B // BB

    ids = x_ids.astype(jnp.int32)
    # NOTE: out-of-range / negative ids produce an all-zero one-hot row
    # (embedding = 0 + pos_enc) instead of raising like nn.Embedding.
    # NOTE: D that is a multiple of 128 keeps output stores lane-dense
    # (fully unmasked vst); other D still works, just with masked stores.

    vmem_bytes = (
        table_bytes                      # resident table (single copy)
        + 2 * TS * D * 4                 # pos_enc tile   (double-buffered)
        + 2 * BB * TS * 4                # ids tile       (double-buffered)
        + 2 * BB * TS * D * 4            # out tile       (double-buffered)
        + V * TS * 4                     # one-hot intermediate
        + TS * D * 4                     # gathered temp
    )
    # Never below the default scoped limit; clamp to v7x's 64 MiB per TC.
    vmem_limit = int(min(max(2 * vmem_bytes + (4 << 20), 32 << 20), 64 << 20))

    grid_spec = pltpu.PrefetchScalarGridSpec(
        num_scalar_prefetch=0,
        grid=(num_st, num_bt),
        in_specs=[
            # Lane-dense (BB, TS) id row block for this (seq-tile, batch-tile).
            pl.BlockSpec((BB, TS), lambda st, bt: (bt, st)),
            # Full embedding table, resident in VMEM once (no double buffering).
            pl.BlockSpec(memory_space=pltpu.MemorySpace.VMEM),
            # pos_enc tile; constant across the inner batch axis -> DMA'd once
            # per sequence tile and reused.
            pl.BlockSpec((TS, D), lambda st, bt: (st, 0)),
        ],
        out_specs=pl.BlockSpec((BB, TS, D), lambda st, bt: (bt, st, 0)),
    )

    return pl.pallas_call(
        _pe_kernel,
        out_shape=jax.ShapeDtypeStruct((B, S, D), emb_table.dtype),
        grid_spec=grid_spec,
        compiler_params=pltpu.CompilerParams(
            dimension_semantics=("parallel", "parallel"),
            vmem_limit_bytes=vmem_limit,
        ),
    )(ids, emb_table, pos_enc)


def make_position_encoding(max_seq_len: int, d_model: int) -> jnp.ndarray:
    """Exactly mirrors the PyTorch __init__ construction."""
    even_i = jnp.arange(0, d_model, 2, dtype=jnp.float32)
    denominator = jnp.power(10000.0, even_i / d_model)
    position = jnp.arange(max_seq_len, dtype=jnp.float32).reshape(max_seq_len, 1)
    even_pe = jnp.sin(position / denominator)                # (S, D/2)
    odd_pe = jnp.cos(position / denominator)                 # (S, D/2)
    stacked = jnp.stack([even_pe, odd_pe], axis=2)           # (S, D/2, 2)
    return stacked.reshape(max_seq_len, d_model)             # (S, D)


if __name__ == "__main__":
    # Small, deterministic config.
    vocab_size = 32
    d_model = 128        # lane-aligned (multiple of 128)
    max_seq_len = 8      # sublane-aligned (multiple of 8)
    batch = 2

    key = jax.random.PRNGKey(0)
    k_emb, k_ids = jax.random.split(key)

    # Deterministic "parameters" (nn.Embedding weight analogue).
    emb_table = jax.random.normal(k_emb, (vocab_size, d_model), dtype=jnp.float32)
    pos_enc = make_position_encoding(max_seq_len, d_model)

    # Input token ids (B, S) — S equals max_seq_len (PyTorch broadcast rule).
    x_ids = jax.random.randint(
        k_ids, (batch, max_seq_len), 0, vocab_size, dtype=jnp.int32
    )

    out = positional_encoding_forward(x_ids, emb_table, pos_enc)
    out = jax.block_until_ready(out)

    # Pure-JAX reference check.
    ref = emb_table[x_ids] + pos_enc[None, :, :]
    assert out.shape == (batch, max_seq_len, d_model)
    assert jnp.allclose(out, ref, atol=1e-6), "mismatch vs reference"

    print("KERNEL_OK")
</pallas_src>

<mosaic_0001>
module attributes {stable_mosaic.version = 11 : i64} {
  func.func @_pe_kernel(%arg0: i32, %arg1: i32, %arg2: memref<2x8xi32, #tpu.memory_space<vmem>>, %arg3: memref<32x128xf32, #tpu.memory_space<vmem>>, %arg4: memref<8x128xf32, #tpu.memory_space<vmem>>, %arg5: memref<2x8x128xf32, #tpu.memory_space<vmem>>) attributes {dimension_semantics = [#tpu.dimension_semantics<parallel>, #tpu.dimension_semantics<parallel>], iteration_bounds = array<i64: 1, 1>, scalar_prefetch = 0 : i64, scratch_operands = 0 : i64, tpu.core_type = #tpu.core_type<tc>, window_params = [{transform_indices = @transform_0, window_bounds = array<i64: 2, 8>}, {pipeline_mode = #tpu.pipeline_mode<synchronous>, transform_indices = @transform_1, window_bounds = array<i64: 32, 128>}, {transform_indices = @transform_2, window_bounds = array<i64: 8, 128>}, {transform_indices = @transform_3, window_bounds = array<i64: 2, 8, 128>}]} {
    %c0 = arith.constant 0 : index
    %c0_0 = arith.constant 0 : index
    %0 = vector.load %arg2[%c0, %c0_0] : memref<2x8xi32, #tpu.memory_space<vmem>>, vector<2x8xi32>
    %c0_1 = arith.constant 0 : index
    %c0_2 = arith.constant 0 : index
    %1 = vector.load %arg3[%c0_1, %c0_2] : memref<32x128xf32, #tpu.memory_space<vmem>>, vector<32x128xf32>
    %c0_3 = arith.constant 0 : index
    %c0_4 = arith.constant 0 : index
    %2 = vector.load %arg4[%c0_3, %c0_4] : memref<8x128xf32, #tpu.memory_space<vmem>>, vector<8x128xf32>
    %3 = tpu.iota {dimensions = array<i32: 0>} : vector<32x8xi32>
    %4 = vector.extract_strided_slice %0 {offsets = [0, 0], sizes = [1, 8], strides = [1, 1]} : vector<2x8xi32> to vector<1x8xi32>
    %5 = vector.broadcast %4 : vector<1x8xi32> to vector<32x8xi32>
    %6 = arith.cmpi eq, %3, %5 : vector<32x8xi32>
    %7 = arith.extui %6 : vector<32x8xi1> to vector<32x8xi32>
    %8 = arith.sitofp %7 : vector<32x8xi32> to vector<32x8xf32>
    %cst = arith.constant dense<0.000000e+00> : vector<8x128xf32>
    %9 = tpu.matmul %8, %1, %cst {dimension_numbers = #tpu.dot_dimension_numbers<[0], [0], [1], [1], [0, 1, 1, 1], [], []>, precision = #tpu.contract_precision<fp32>} : vector<32x8xf32>, vector<32x128xf32>, vector<8x128xf32> -> vector<8x128xf32>
    %10 = arith.addf %9, %2 : vector<8x128xf32>
    %c0_5 = arith.constant 0 : index
    %c0_6 = arith.constant 0 : index
    %c0_7 = arith.constant 0 : index
    %11 = vector.load %arg5[%c0_5, %c0_6, %c0_7] : memref<2x8x128xf32, #tpu.memory_space<vmem>>, vector<1x8x128xf32>
    %12 = vector.shape_cast %11 : vector<1x8x128xf32> to vector<8x128xf32>
    %13 = vector.shape_cast %10 : vector<8x128xf32> to vector<1x8x128xf32>
    tpu.vector_store %arg5[%c0_5, %c0_6, %c0_7], %13 {strides = array<i32>} : memref<2x8x128xf32, #tpu.memory_space<vmem>>, vector<1x8x128xf32>,
    %14 = vector.extract_strided_slice %0 {offsets = [1, 0], sizes = [1, 8], strides = [1, 1]} : vector<2x8xi32> to vector<1x8xi32>
    %15 = vector.broadcast %14 : vector<1x8xi32> to vector<32x8xi32>
    %16 = arith.cmpi eq, %3, %15 : vector<32x8xi32>
    %17 = arith.extui %16 : vector<32x8xi1> to vector<32x8xi32>
    %18 = arith.sitofp %17 : vector<32x8xi32> to vector<32x8xf32>
    %cst_8 = arith.constant dense<0.000000e+00> : vector<8x128xf32>
    %19 = tpu.matmul %18, %1, %cst_8 {dimension_numbers = #tpu.dot_dimension_numbers<[0], [0], [1], [1], [0, 1, 1, 1], [], []>, precision = #tpu.contract_precision<fp32>} : vector<32x8xf32>, vector<32x128xf32>, vector<8x128xf32> -> vector<8x128xf32>
    %20 = arith.addf %19, %2 : vector<8x128xf32>
    %c1 = arith.constant 1 : index
    %c0_9 = arith.constant 0 : index
    %c0_10 = arith.constant 0 : index
    %21 = vector.load %arg5[%c1, %c0_9, %c0_10] : memref<2x8x128xf32, #tpu.memory_space<vmem>>, vector<1x8x128xf32>
    %22 = vector.shape_cast %21 : vector<1x8x128xf32> to vector<8x128xf32>
    %23 = vector.shape_cast %20 : vector<8x128xf32> to vector<1x8x128xf32>
    tpu.vector_store %arg5[%c1, %c0_9, %c0_10], %23 {strides = array<i32>} : memref<2x8x128xf32, #tpu.memory_space<vmem>>, vector<1x8x128xf32>,
    return
  }
  func.func @transform_0(%arg0: i32, %arg1: i32) -> (i32, i32) {
    %c0_i32 = arith.constant 0 : i32
    return %arg1, %arg0 : i32, i32
  }
  func.func @transform_1(%arg0: i32, %arg1: i32) -> (i32, i32) {
    %c0_i32 = arith.constant 0 : i32
    %c0_i32_0 = arith.constant 0 : i32
    %c0_i32_1 = arith.constant 0 : i32
    return %c0_i32, %c0_i32_0 : i32, i32
  }
  func.func @transform_2(%arg0: i32, %arg1: i32) -> (i32, i32) {
    %c0_i32 = arith.constant 0 : i32
    %c0_i32_0 = arith.constant 0 : i32
    return %arg0, %c0_i32 : i32, i32
  }
  func.func @transform_3(%arg0: i32, %arg1: i32) -> (i32, i32, i32) {
    %c0_i32 = arith.constant 0 : i32
    %c0_i32_0 = arith.constant 0 : i32
    return %arg1, %arg0, %c0_i32 : i32, i32, i32
  }
}

</mosaic_0001>

<bundles_post_ra>
// kernel: tpu_custom_call.1
= control target key start
LH: loop header
LB: loop body
LE: loop exit
PB: predicated region body
PF: predicated region fallthrough
CT: control target
= control target key end

     0   :  { %8 = vsyncpa [#allocation3], 0  ;;  %s1734_s0 = inlined_call_operand.hbm [shape: s32[2,8], index: 0, kind: input, shape index: {}]   ;;  %s1735_s1 = inlined_call_operand.hbm [shape: f32[32,128], index: 1, kind: input, shape index: {}]   ;;  %s1736_s2 = inlined_call_operand.hbm [shape: f32[8,128], index: 2, kind: input, shape index: {}]   ;;  %s1737_s3 = inlined_call_operand.hbm [shape: f32[2,8,128], index: 3, kind: output, shape index: {}]  }
   0x1   :  { %9 = vsyncpa [#allocation6], 0 }
   0x2   :  { %10 = vsyncpa [#allocation4], 0  ;;  %s1567_s12 = smov [#allocation5]   ;;  %s1473_s16 = scalar_lea.hbm %s1735_s1, 512 }
   0x3   :  { %s26_s13 = sshll.u32 %s1567_s12, 4  ;;  %p1474_p0 = scmp.ne.s32.totalorder %s1735_s1, %s1473_s16  ;;  %s27_s13 = int_to_ptr.vmem [resolvable:$true] %s26_s13 }
   0x4   :  { %p1477_p1 = scmp.lt.u32.totalorder %s1473_s16, %s1735_s1 }
   0x6   :  { %p1479_p2 = pnand %p1477_p1, %p1474_p0 }
   0x8   :  { %1482 = shalt.err (!%p1479_p2)
}
   0x9   :  { %s1483_s21 = scalar_lea.vmem %s27_s13, 512  ;;  %p1488_p4 = scmp.lt.s32.totalorder %s27_s13, %s27_s13 }
   0xa   :  { %p1484_p3 = scmp.ne.s32.totalorder %s27_s13, %s1483_s21  ;;  %p1489_p5 = scmp.lt.s32.totalorder %s1483_s21, %s1483_s21 }
   0xc   :  { %p1490_p6 = por %p1489_p5, %p1488_p4 }
   0xe   :  { %p1491_p7 = pnand %p1490_p6, %p1484_p3 }
  0x10   :  { %1494 = shalt.err (!%p1491_p7)
}
  0x11   :  { %s1568_s22 = smov 128   ;;  %s1569_s23 = smov 8  }
  0x12   :  { %32 = dma.hbm_to_vmem [thread:$0]  %s1735_s1, 512, %s27_s13, [#allocation6], %s1568_s22, %s1568_s22, %s1569_s23  }
  0x13   :  { %s1570_s26 = smov [#allocation2]   ;;  %s1571_s28 = smov [#allocation7]  }
  0x14   :  { %s17_s27 = sshll.u32 %s1570_s26, 4  ;;  %s39_s29 = sshll.u32 %s1571_s28, 4  ;;  %s18_s27 = int_to_ptr.vmem [resolvable:$true] %s17_s27  ;;  %s40_s29 = int_to_ptr.vmem [resolvable:$true] %s39_s29 }
  0x15   :  { %s1495_s5 = scalar_lea.hbm %s1734_s0, 32 }
  0x16   :  { %p1496_p8 = scmp.ne.s32.totalorder %s1734_s0, %s1495_s5  ;;  %p1499_p9 = scmp.lt.u32.totalorder %s1495_s5, %s1734_s0 }
  0x18   :  { %p1501_p10 = pnand %p1499_p9, %p1496_p8 }
  0x1a   :  { %1504 = shalt.err (!%p1501_p10)
}
  0x1b   :  { %s1505_s1 = scalar_lea.vmem %s18_s27, 32  ;;  %p1510_p12 = scmp.lt.s32.totalorder %s18_s27, %s18_s27 }
  0x1c   :  { %p1506_p11 = scmp.ne.s32.totalorder %s18_s27, %s1505_s1  ;;  %p1511_p13 = scmp.lt.s32.totalorder %s1505_s1, %s1505_s1 }
  0x1e   :  { %p1512_p0 = por %p1511_p13, %p1510_p12 }
  0x20   :  { %p1513_p1 = pnand %p1512_p0, %p1506_p11 }
  0x22   :  { %1516 = shalt.err (!%p1513_p1)
}
  0x23   :  { %20 = dma.hbm_to_vmem [thread:$0]  %s1734_s0, 32, %s18_s27, [#allocation3]  }
  0x24   :  { %s1517_s14 = scalar_lea.hbm %s1736_s2, 128 }
  0x25   :  { %p1518_p2 = scmp.ne.s32.totalorder %s1736_s2, %s1517_s14  ;;  %p1521_p3 = scmp.lt.u32.totalorder %s1517_s14, %s1736_s2 }
  0x27   :  { %p1523_p4 = pnand %p1521_p3, %p1518_p2 }
  0x29   :  { %1526 = shalt.err (!%p1523_p4)
}
  0x2a   :  { %s1527_s19 = scalar_lea.vmem %s40_s29, 128  ;;  %p1532_p6 = scmp.lt.s32.totalorder %s40_s29, %s40_s29 }
  0x2b   :  { %p1528_p5 = scmp.ne.s32.totalorder %s40_s29, %s1527_s19  ;;  %p1533_p7 = scmp.lt.s32.totalorder %s1527_s19, %s1527_s19 }
  0x2d   :  { %p1534_p8 = por %p1533_p7, %p1532_p6 }
  0x2f   :  { %p1535_p9 = pnand %p1534_p8, %p1528_p5 }
  0x31   :  { %1538 = shalt.err (!%p1535_p9)
}
  0x32   :  { %42 = dma.hbm_to_vmem [thread:$0]  %s1736_s2, 128, %s40_s29, [#allocation6]  }
  0x33   :  { %1561 = dma.done.wait [#allocation3], 32  }
  0x34   :  { %1562 = vsyncadd [#allocation3], 4294967264 }
  0x35   :  { %1563 = dma.done.wait [#allocation6], 640  }
  0x36   :  { %1564 = vsyncadd [#allocation6], 4294966656  ;;  %v58_v0 = vlaneseq  ;;  %v52_v5 = vld [vmem:[#allocation2] sm:$0x3]  ;;  %v1572_v10 = vmov 0.0   ;;  %v53_v19 = vld [vmem:[#allocation5] sm:$0xff] }
  0x37   :  { %v54_v20 = vld [vmem:[#allocation5 + $0x8] sm:$0xff]  ;;  %v116_v21 = vand.u32 4294901760, %v53_v19  ;;  %v1573_v29 = vmov 0.0|0.0   ;;  %v55_v30 = vld [vmem:[#allocation5 + $0x10] sm:$0xff]  ;;  %v56_v31 = vld [vmem:[#allocation5 + $0x18] sm:$0xff]  ;;  %vm1574_vm8 = vmmov 0  }
  0x38   :  { %v59_v1 = vshrl.u32 %v58_v0, 7  ;;  %v119_v22 = vand.u32 4294901760, %v54_v20  ;;  %1357 = vmatprep.subr.bf16.mxu0 %v1573_v29  ;;  %1393 = vmatprep.subr.bf16.mxu1 %v1573_v29  ;;  %v122_v32 = vand.u32 4294901760, %v55_v30  ;;  %v125_v33 = vand.u32 4294901760, %v56_v31  ;;  %s1575_s2 = smov [#allocation8]  }
  0x39   :  { %v196_v27 = vsub.f32 %v53_v19, %v116_v21  ;;  %1233 = vmatprep.mubr.msk.f32.mxu0 %vm1574_vm8, %v1572_v10  ;;  %1299 = vmatprep.mubr.msk.f32.mxu1 %vm1574_vm8, %v1572_v10  ;;  %vm111_vm9 = vcmask 261120   ;;  %s1144_s21 = sshll.u32 %s1575_s2, 4  ;;  %s1145_s21 = int_to_ptr.vmem [resolvable:$true] %s1144_s21 }
  0x3a   :  { %v65_v2 = vsub.s32 0, %v59_v1  ;;  %v603_v3 = vsub.s32 1, %v59_v1  ;;  %v60_v4 = vadd.s32 8, %v59_v1  ;;  %v61_v8 = vadd.s32 16, %v59_v1  ;;  %s1539_s24 = scalar_lea.vmem %s1145_s21, 256  ;;  %p1544_p11 = scmp.lt.s32.totalorder %s1145_s21, %s1145_s21 }
  0x3b   :  { %v62_v9 = vadd.s32 24, %v59_v1  ;;  %v1643_v26 = vpack.c.bf16 %v119_v22, %v116_v21  ;;  %v203_v28 = vsub.f32 %v54_v20, %v119_v22  ;;  %v197_v34 = vand.u32 4294901760, %v196_v27  ;;  %p1540_p10 = scmp.ne.s32.totalorder %s1145_s21, %s1539_s24  ;;  %p1545_p12 = scmp.lt.s32.totalorder %s1539_s24, %s1539_s24 }
  0x3c   :  { %v66_v6 = vrot.slane %v52_v5, %v65_v2  ;;  %v604_v7 = vrot.slane %v52_v5, %v603_v3  ;;  %v1651_v37 = vpack.c.bf16 %v125_v33, %v122_v32  ;;  %v210_v40 = vsub.f32 %v55_v30, %v122_v32 }
  0x3d   :  { %1359 = vmatpush3.bf16.msra.mxu0 %v1643_v26  ;;  %1395 = vmatpush3.bf16.msra.mxu1 %v1643_v26  ;;  %v204_v35 = vand.u32 4294901760, %v203_v28  ;;  %v198_v38 = vsub.f32 %v196_v27, %v197_v34  ;;  %v217_v41 = vsub.f32 %v56_v31, %v125_v33  ;;  %v1370_v52 = vpack.c.bf16 %v203_v28, %v196_v27  ;;  %p1546_p13 = por %p1545_p12, %p1544_p11 }
  0x3e   :  { %vm67_vm0 = vcmp.eq.s32.totalorder %v59_v1, %v66_v6  ;;  %vm605_vm1 = vcmp.eq.s32.totalorder %v59_v1, %v604_v7  ;;  %vm68_vm2 = vcmp.eq.s32.totalorder %v60_v4, %v66_v6  ;;  %vm606_vm3 = vcmp.eq.s32.totalorder %v60_v4, %v604_v7  ;;  %1360 = vmatprep.subr.bf16.mxu0 %v1573_v29 }
  0x3f   :  { %v1157_v11 = vsel %vm67_vm0, 1.0, %v1572_v10  ;;  %v1161_v12 = vsel %vm605_vm1, 1.0, %v1572_v10  ;;  %v1158_v13 = vsel %vm68_vm2, 1.0, %v1572_v10  ;;  %v1162_v14 = vsel %vm606_vm3, 1.0, %v1572_v10  ;;  %1396 = vmatprep.subr.bf16.mxu1 %v1573_v29  ;;  %p1547_p0 = pnand %p1546_p13, %p1540_p10 }
  0x40   :  { %v1460_v15 = vpack.i.bf16 %v1161_v12, %v1157_v11  ;;  %vm69_vm4 = vcmp.eq.s32.totalorder %v61_v8, %v66_v6  ;;  %vm607_vm5 = vcmp.eq.s32.totalorder %v61_v8, %v604_v7  ;;  %v1462_v16 = vpack.i.bf16 %v1162_v14, %v1158_v13 }
  0x41   :  { %v1159_v17 = vsel %vm69_vm4, 1.0, %v1572_v10  ;;  %v1163_v18 = vsel %vm607_vm5, 1.0, %v1572_v10  ;;  %vm70_vm6 = vcmp.eq.s32.totalorder %v62_v9, %v66_v6  ;;  %vm608_vm7 = vcmp.eq.s32.totalorder %v62_v9, %v604_v7  ;;  %1362 = vmatpush3.bf16.msra.mxu0 %v1651_v37  ;;  %1398 = vmatpush3.bf16.msra.mxu1 %v1651_v37  ;;  %v57_v7 = vld [vmem:[#allocation7] sm:$0xff] }
  0x42   :  { %1461 = vxpose.xlu0.b32.start [1/4] (short) (narrow) %v1460_v15, 8  ;;  %v1464_v23 = vpack.i.bf16 %v1163_v18, %v1159_v17  ;;  %v1160_v24 = vsel %vm70_vm6, 1.0, %v1572_v10  ;;  %v1164_v25 = vsel %vm608_vm7, 1.0, %v1572_v10  ;;  %v205_v39 = vsub.f32 %v203_v28, %v204_v35  ;;  %1363 = vmatprep.subr.bf16.mxu0 %v1573_v29 }
  0x43   :  { %v1466_v36 = vpack.i.bf16 %v1164_v25, %v1160_v24  ;;  %v199_v42 = vand.u32 4294901760, %v198_v38  ;;  %v211_v44 = vand.u32 4294901760, %v210_v40  ;;  %v218_v45 = vand.u32 4294901760, %v217_v41  ;;  %1399 = vmatprep.subr.bf16.mxu1 %v1573_v29 }
  0x44   :  { %v206_v43 = vand.u32 4294901760, %v205_v39  ;;  %v1373_v53 = vpack.c.bf16 %v217_v41, %v210_v40  ;;  %v1382_v54 = vpack.c.bf16 %v204_v35, %v197_v34 }
  0x45   :  { %v212_v47 = vsub.f32 %v210_v40, %v211_v44  ;;  %v219_v48 = vsub.f32 %v217_v41, %v218_v45  ;;  %v1385_v55 = vpack.c.bf16 %v218_v45, %v211_v44 }
  0x46   :  { %1463 = vxpose.xlu0.b32.cont [2/4] (short) (narrow) %v1462_v16, 8  ;;  %v1364_v46 = vpack.c.bf16 %v206_v43, %v199_v42 }
  0x47   :  { %v213_v49 = vand.u32 4294901760, %v212_v47  ;;  %v220_v50 = vand.u32 4294901760, %v219_v48 }
  0x49   :  { %v1367_v51 = vpack.c.bf16 %v220_v50, %v213_v49 }
  0x4a   :  { %1465 = vxpose.xlu0.b32.cont [3/4] (short) (narrow) %v1464_v23, 8 }
  0x4e   :  { %1467 = vxpose.xlu0.b32.end [4/4] (short) (narrow) %v1466_v36, 8 }
  0xc2   :  { %v1468_v56 = vpop.trf.xlu0 }
  0xc3   :  { %v1472_v57 = vunpack.i.h.bf16 %v1468_v56  ;;  %v1469_v58 = vunpack.i.l.bf16 %v1468_v56 }
  0xc5   :  { %v650_v59 = vsel %vm111_vm9, %v1472_v57, 0  ;;  %v113_v60 = vsel %vm111_vm9, %v1469_v58, 0 }
  0xc6   :  { %v1661_v61 = vand.u32 4294901760, %v650_v59  ;;  %v1663_v62 = vand.u32 4294901760, %v113_v60 }
  0xc8   :  { %v722_v63 = vsub.f32 %v650_v59, %v1661_v61  ;;  %v185_v0 = vsub.f32 %v113_v60, %v1663_v62 }
  0xca   :  { %v186_v1 = vand.u32 4294901760, %v185_v0  ;;  %v723_v2 = vand.u32 4294901760, %v722_v63 }
  0xcc   :  { %v187_v3 = vsub.f32 %v185_v0, %v186_v1  ;;  %v724_v4 = vsub.f32 %v722_v63, %v723_v2 }
  0xce   :  { %v188_v5 = vand.u32 4294901760, %v187_v3  ;;  %v725_v6 = vand.u32 4294901760, %v724_v4 }
  0xd0   :  { %1234 = vmatmul.mubr.f32.vlgmr.msra.gmra.mrb[0].mxu0 %v188_v5  ;;  %1300 = vmatmul.mubr.f32.vlgmr.msra.gmra.mrb[0].mxu1 %v725_v6 }
  0xd1   :  { %1365 = vmatpush3.bf16.msra.mxu0 %v1364_v46  ;;  %1401 = vmatpush3.bf16.msra.mxu1 %v1364_v46 }
  0xd2   :  { %1366 = vmatprep.subr.bf16.mxu0 %v1573_v29  ;;  %1402 = vmatprep.subr.bf16.mxu1 %v1573_v29 }
  0xd3   :  { %1244 = vmatprep.mubr.msk.f32.mxu0 %vm1574_vm8, %v1572_v10  ;;  %1310 = vmatprep.mubr.msk.f32.mxu1 %vm1574_vm8, %v1572_v10 }
  0xd5   :  { %1368 = vmatpush3.bf16.msra.mxu0 %v1367_v51  ;;  %1404 = vmatpush3.bf16.msra.mxu1 %v1367_v51 }
  0xd6   :  { %1369 = vmatprep.subr.bf16.mxu0 %v1573_v29  ;;  %1405 = vmatprep.subr.bf16.mxu1 %v1573_v29 }
  0xd8   :  { %1245 = vmatmul.mubr.f32.vlgmr.msra.gmra.mrb[0].mxu0 %v1663_v62  ;;  %1311 = vmatmul.mubr.f32.vlgmr.msra.gmra.mrb[0].mxu1 %v1661_v61 }
  0xd9   :  { %1371 = vmatpush3.bf16.msra.mxu0 %v1370_v52  ;;  %1407 = vmatpush3.bf16.msra.mxu1 %v1370_v52 }
  0xda   :  { %1372 = vmatprep.subr.bf16.mxu0 %v1573_v29  ;;  %1408 = vmatprep.subr.bf16.mxu1 %v1573_v29 }
  0xdb   :  { %1255 = vmatprep.mubr.msk.f32.mxu0 %vm1574_vm8, %v1572_v10  ;;  %1321 = vmatprep.mubr.msk.f32.mxu1 %vm1574_vm8, %v1572_v10 }
  0xdd   :  { %1374 = vmatpush3.bf16.msra.mxu0 %v1373_v53  ;;  %1410 = vmatpush3.bf16.msra.mxu1 %v1373_v53 }
  0xde   :  { %1375 = vmatprep.subr.bf16.mxu0 %v1573_v29  ;;  %1411 = vmatprep.subr.bf16.mxu1 %v1573_v29 }
  0xe0   :  { %1256 = vmatmul.mubr.f32.vlgmr.msra.gmra.mrb[0].mxu0 %v185_v0  ;;  %1322 = vmatmul.mubr.f32.vlgmr.msra.gmra.mrb[0].mxu1 %v722_v63 }
  0xe1   :  { %1377 = vmatpush3.bf16.msra.mxu0 %v1643_v26  ;;  %1413 = vmatpush3.bf16.msra.mxu1 %v1643_v26 }
  0xe2   :  { %1378 = vmatprep.subr.bf16.mxu0 %v1573_v29  ;;  %1414 = vmatprep.subr.bf16.mxu1 %v1573_v29 }
  0xe3   :  { %1266 = vmatprep.mubr.msk.f32.mxu0 %vm1574_vm8, %v1572_v10  ;;  %1332 = vmatprep.mubr.msk.f32.mxu1 %vm1574_vm8, %v1572_v10 }
  0xe5   :  { %1380 = vmatpush3.bf16.msra.mxu0 %v1651_v37  ;;  %1416 = vmatpush3.bf16.msra.mxu1 %v1651_v37 }
  0xe6   :  { %1381 = vmatprep.subr.bf16.mxu0 %v1573_v29  ;;  %1417 = vmatprep.subr.bf16.mxu1 %v1573_v29 }
  0xe8   :  { %1267 = vmatmul.mubr.f32.vlgmr.msra.gmra.mrb[0].mxu0 %v186_v1  ;;  %1333 = vmatmul.mubr.f32.vlgmr.msra.gmra.mrb[0].mxu1 %v723_v2 }
  0xe9   :  { %1383 = vmatpush3.bf16.msra.mxu0 %v1382_v54  ;;  %1419 = vmatpush3.bf16.msra.mxu1 %v1382_v54 }
  0xea   :  { %1384 = vmatprep.subr.bf16.mxu0 %v1573_v29  ;;  %1420 = vmatprep.subr.bf16.mxu1 %v1573_v29 }
  0xeb   :  { %1277 = vmatprep.mubr.msk.f32.mxu0 %vm1574_vm8, %v1572_v10  ;;  %1343 = vmatprep.mubr.msk.f32.mxu1 %vm1574_vm8, %v1572_v10 }
  0xed   :  { %1386 = vmatpush3.bf16.msra.mxu0 %v1385_v55  ;;  %1422 = vmatpush3.bf16.msra.mxu1 %v1385_v55 }
  0xee   :  { %1387 = vmatprep.subr.bf16.mxu0 %v1573_v29  ;;  %1423 = vmatprep.subr.bf16.mxu1 %v1573_v29 }
  0xf0   :  { %1278 = vmatmul.mubr.f32.vlgmr.msra.gmra.mrb[0].mxu0 %v1663_v62  ;;  %1344 = vmatmul.mubr.f32.vlgmr.msra.gmra.mrb[0].mxu1 %v1661_v61 }
  0xf1   :  { %1389 = vmatpush3.bf16.msra.mxu0 %v1643_v26  ;;  %1425 = vmatpush3.bf16.msra.mxu1 %v1643_v26 }
  0xf2   :  { %1390 = vmatprep.subr.bf16.mxu0 %v1573_v29  ;;  %1426 = vmatprep.subr.bf16.mxu1 %v1573_v29 }
  0xf3   :  { %1288 = vmatprep.mubr.msk.f32.mxu0 %vm1574_vm8, %v1572_v10  ;;  %1354 = vmatprep.mubr.msk.f32.mxu1 %vm1574_vm8, %v1572_v10 }
  0xf5   :  { %1392 = vmatpush3.bf16.msra.mxu0 %v1651_v37  ;;  %1428 = vmatpush3.bf16.msra.mxu1 %v1651_v37 }
  0xf8   :  { %1289 = vmatmul.mubr.f32.vlgmr.msra.gmra.mrb[0].mxu0 %v1663_v62  ;;  %1355 = vmatmul.mubr.f32.vlgmr.msra.gmra.mrb[0].mxu1 %v1661_v61 }
 0x1cb   :  { %v596_v8 = vpop.f32.mrb[0].mxu0  ;;  %v1133_v9 = vpop.f32.mrb[0].mxu1 }
 0x1cc   :  { %v1429_v11 = vadd.f32 %v596_v8, %v57_v7  ;;  %v1430_v12 = vadd.f32 %v1133_v9, %v57_v7  ;;  %v1290_v13 = vpop.f32.mrb[1].mxu0  ;;  %v1356_v14 = vpop.f32.mrb[1].mxu1 }
 0x1ce   :  { %600 = vst [vmem:[#allocation8] sm:$0xff] %v1429_v11  ;;  %1138 = vst [vmem:[#allocation8 + $0x8] sm:$0xff] %v1430_v12 }
 0x1cf   :  { %1550 = shalt.err (!%p1547_p0)
}
 0x1d0   :  { %s1551_s27 = scalar_lea.hbm %s1737_s3, 256 }
 0x1d1   :  { %p1552_p1 = scmp.ne.s32.totalorder %s1737_s3, %s1551_s27  ;;  %p1555_p2 = scmp.lt.u32.totalorder %s1551_s27, %s1737_s3 }
 0x1d3   :  { %p1557_p3 = pnand %p1555_p2, %p1552_p1 }
 0x1d5   :  { %1560 = shalt.err (!%p1557_p3)
}
 0x1d6   :  { %1150 = dma.vmem_to_hbm [thread:$0]  %s1145_s21, 256, %s1737_s3, [#allocation4], %s1568_s22, %s1568_s22, %s1569_s23  }
 0x1d7   :  { %1565 = dma.done.wait [#allocation4], 256  }
 0x1d8   :  { %1566 = vsyncadd [#allocation4], 4294967040 }
 0x1d9   :  { %1154 = vsyncpa [#allocation3], 1 }
 0x1da   :  { %1155 = vsyncpa [#allocation6], 1 }
 0x1db   :  { %1156 = vsyncpa [#allocation4], 1 }

</bundles_post_ra>
